<compile_context>
chip_gen: v6e
topology: v6e:2x2x1
jax: 0.10.0
libtpu: 0.0.40
codegen_flags: <defaults>
</compile_context>

<pallas_src>
import functools

import jax
import jax.numpy as jnp
from jax.experimental import pallas as pl
from jax.experimental.pallas import tpu as pltpu


# Max lane tile along the flattened spatial dim.  Per-grid-step overhead is ~0.35 us
# and mem-bound tiling reaches ~85% of HBM roofline by 512 lanes; 512 also keeps the
# f32 accumulator comfortably inside the register file / VMEM for realistic Cout*K*K.
_MAX_TILE_HW = 512


def _upsample_mm_kernel(x_ref, w_ref, b_ref, o_ref):
    """One (batch, hw-tile) step:  out = w_t @ x_tile + bias  (lane dim = spatial).

    x_ref: (1, Cin, T)   activation tile, lanes = flattened (h, w) positions
    w_ref: (R, Cin)      R = Cout*K*K, rows ordered (co, kh, kw)
    b_ref: (R, 1)        bias column (bias[co] repeated K*K times)
    o_ref: (1, R, T)     lane-dense output tile
    """
    cin = w_ref.shape[1]
    x = x_ref[0]          # (Cin, T)
    w = w_ref[...]        # (R, Cin)

    # Tiny contraction (Cin ~ 4): VPU outer-product accumulation instead of a
    # padded-to-128/256 MXU contraction.  All broadcasts are static slices.
    acc = w[:, 0:1] * x[0:1, :]                       # (R, T), f32
    for ci in range(1, cin):                          # static, unrolled
        acc = acc + w[:, ci:ci + 1] * x[ci:ci + 1, :]
    o_ref[0] = (acc + b_ref[...]).astype(o_ref.dtype)


def _upsample_matmul(x3, w_t, b_col):
    """x3: (N, Cin, HW), w_t: (R, Cin), b_col: (R, 1)  ->  (N, R, HW)."""
    N, Cin, HW = x3.shape
    R = w_t.shape[0]
    itemsize = jnp.dtype(x3.dtype).itemsize

    # Whole row if it fits, else 512-lane tiles; the (possibly partial) tail block is
    # handled by Pallas' boundary masking — no divisibility requirement on H*W.
    t_hw = HW if HW <= _MAX_TILE_HW else _MAX_TILE_HW
    grid = (N, pl.cdiv(HW, t_hw))     # always >= 2 parallel steps (N >= 2)

    cost = pl.CostEstimate(
        flops=2 * N * HW * Cin * R,
        transcendentals=0,
        bytes_accessed=(x3.size + w_t.size + b_col.size + N * R * HW) * itemsize,
    )

    return pl.pallas_call(
        _upsample_mm_kernel,
        out_shape=jax.ShapeDtypeStruct((N, R, HW), x3.dtype),
        grid_spec=pltpu.PrefetchScalarGridSpec(
            num_scalar_prefetch=0,
            grid=grid,
            in_specs=[
                pl.BlockSpec((1, Cin, t_hw), lambda n, j: (n, 0, j)),
                pl.BlockSpec((R, Cin), lambda n, j: (0, 0)),
                pl.BlockSpec((R, 1), lambda n, j: (0, 0)),
            ],
            out_specs=pl.BlockSpec((1, R, t_hw), lambda n, j: (n, 0, j)),
        ),
        compiler_params=pltpu.CompilerParams(
            dimension_semantics=("parallel", "parallel"),
            vmem_limit_bytes=32 * 1024 * 1024,   # explicit budget; safe on v7x's 64 MiB VMEM
        ),
        cost_estimate=cost,
    )(x3, w_t, b_col)


def upsample_forward(x, weight, bias, *, kernel, stride):
    """ConvTranspose2d(input_dim, output_dim, kernel_size=kernel, stride=stride).

    x:      (N, Cin, H, W)      float32, NCHW
    weight: (Cin, Cout, K, K)   PyTorch ConvTranspose2d weight layout
    bias:   (Cout,)
    returns (N, Cout, H*K, W*K)   (== (H-1)*stride + K when kernel == stride)
    """
    assert kernel == stride, "this kernel covers the non-overlapping upsample case"
    N, Cin, H, W = x.shape
    Cin_w, Cout, K, _ = weight.shape
    assert Cin_w == Cin and K == kernel
    R = Cout * K * K

    # Free reshape — NCHW already has the big spatial dim last (no input transpose).
    x3 = x.reshape(N, Cin, H * W)

    # Tiny parameter-side rearrangements (Cin*Cout*K*K elements).
    w_t = jnp.transpose(weight.reshape(Cin, R))          # (R, Cin), rows = (co, kh, kw)
    b_col = jnp.repeat(bias, K * K).reshape(R, 1)        # (R, 1)

    out_t = _upsample_matmul(x3, w_t, b_col)             # (N, R, H*W), lane-dense

    # Single fused XLA rearrangement (co,kh,kw)x(h,w) -> NCHW; required only by the
    # NCHW output contract.  TODO(synk): NHWC activations would remove it entirely.
    y = out_t.reshape(N, Cout, K, K, H, W)
    y = jnp.transpose(y, (0, 1, 4, 2, 5, 3)).reshape(N, Cout, H * K, W * K)
    return y


if __name__ == "__main__":
    # Module hyperparameters (typical 2x upsample).
    input_dim, output_dim, kernel, stride = 4, 8, 2, 2

    key = jax.random.PRNGKey(0)
    kx, kw, kb = jax.random.split(key, 3)

    # Input: NCHW, small shapes.
    x = jax.random.normal(kx, (2, input_dim, 16, 16), dtype=jnp.float32)

    # Deterministic parameter init (PyTorch ConvTranspose2d weight layout).
    fan_in = input_dim * kernel * kernel
    bound = 1.0 / (fan_in ** 0.5)
    weight = jax.random.uniform(
        kw, (input_dim, output_dim, kernel, kernel),
        minval=-bound, maxval=bound, dtype=jnp.float32)
    bias = jax.random.uniform(
        kb, (output_dim,), minval=-bound, maxval=bound, dtype=jnp.float32)

    fwd = jax.jit(functools.partial(upsample_forward, kernel=kernel, stride=stride))
    y = fwd(x, weight, bias)
    jax.block_until_ready(y)

    # Exact f32 reference (pure broadcast-sum, no matmul-precision ambiguity).
    # ref6[n, co, h, kh, w, kw] = sum_ci x[n, ci, h, w] * weight[ci, co, kh, kw]
    ref = (x[:, :, None, :, None, :, None] *
           weight[None, :, :, None, :, None, :]).sum(axis=1)
    ref = ref.reshape(x.shape[0], output_dim, 16 * kernel, 16 * kernel)
    ref = ref + bias[None, :, None, None]

    assert y.shape == (2, output_dim, 32, 32), y.shape
    assert jnp.allclose(y, ref, atol=1e-4, rtol=1e-4), float(jnp.max(jnp.abs(y - ref)))

    print("KERNEL_OK")
</pallas_src>

<mosaic_0001>
module attributes {stable_mosaic.version = 11 : i64} {
  func.func @_upsample_mm_kernel(%arg0: i32, %arg1: i32, %arg2: memref<1x4x256xf32, #tpu.memory_space<vmem>>, %arg3: memref<32x4xf32, #tpu.memory_space<vmem>>, %arg4: memref<32x1xf32, #tpu.memory_space<vmem>>, %arg5: memref<1x32x256xf32, #tpu.memory_space<vmem>>) attributes {dimension_semantics = [#tpu.dimension_semantics<parallel>, #tpu.dimension_semantics<parallel>], iteration_bounds = array<i64: 2, 1>, scalar_prefetch = 0 : i64, scratch_operands = 0 : i64, tpu.core_type = #tpu.core_type<tc>, window_params = [{transform_indices = @transform_0, window_bounds = array<i64: 1, 4, 256>}, {pipeline_mode = #tpu.pipeline_mode<synchronous>, transform_indices = @transform_1, window_bounds = array<i64: 32, 4>}, {pipeline_mode = #tpu.pipeline_mode<synchronous>, transform_indices = @transform_2, window_bounds = array<i64: 32, 1>}, {transform_indices = @transform_3, window_bounds = array<i64: 1, 32, 256>}]} {
    %c0 = arith.constant 0 : index
    %c0_0 = arith.constant 0 : index
    %c0_1 = arith.constant 0 : index
    %0 = vector.load %arg2[%c0, %c0_0, %c0_1] : memref<1x4x256xf32, #tpu.memory_space<vmem>>, vector<1x4x256xf32>
    %1 = vector.shape_cast %0 : vector<1x4x256xf32> to vector<4x256xf32>
    %c0_2 = arith.constant 0 : index
    %c0_3 = arith.constant 0 : index
    %2 = vector.load %arg3[%c0_2, %c0_3] : memref<32x4xf32, #tpu.memory_space<vmem>>, vector<32x4xf32>
    %3 = vector.extract_strided_slice %2 {offsets = [0, 0], sizes = [32, 1], strides = [1, 1]} : vector<32x4xf32> to vector<32x1xf32>
    %4 = vector.extract_strided_slice %1 {offsets = [0, 0], sizes = [1, 256], strides = [1, 1]} : vector<4x256xf32> to vector<1x256xf32>
    %5 = vector.broadcast %3 : vector<32x1xf32> to vector<32x256xf32>
    %6 = vector.broadcast %4 : vector<1x256xf32> to vector<32x256xf32>
    %7 = arith.mulf %5, %6 : vector<32x256xf32>
    %8 = vector.extract_strided_slice %2 {offsets = [0, 1], sizes = [32, 1], strides = [1, 1]} : vector<32x4xf32> to vector<32x1xf32>
    %9 = vector.extract_strided_slice %1 {offsets = [1, 0], sizes = [1, 256], strides = [1, 1]} : vector<4x256xf32> to vector<1x256xf32>
    %10 = vector.broadcast %8 : vector<32x1xf32> to vector<32x256xf32>
    %11 = vector.broadcast %9 : vector<1x256xf32> to vector<32x256xf32>
    %12 = arith.mulf %10, %11 : vector<32x256xf32>
    %13 = arith.addf %7, %12 : vector<32x256xf32>
    %14 = vector.extract_strided_slice %2 {offsets = [0, 2], sizes = [32, 1], strides = [1, 1]} : vector<32x4xf32> to vector<32x1xf32>
    %15 = vector.extract_strided_slice %1 {offsets = [2, 0], sizes = [1, 256], strides = [1, 1]} : vector<4x256xf32> to vector<1x256xf32>
    %16 = vector.broadcast %14 : vector<32x1xf32> to vector<32x256xf32>
    %17 = vector.broadcast %15 : vector<1x256xf32> to vector<32x256xf32>
    %18 = arith.mulf %16, %17 : vector<32x256xf32>
    %19 = arith.addf %13, %18 : vector<32x256xf32>
    %20 = vector.extract_strided_slice %2 {offsets = [0, 3], sizes = [32, 1], strides = [1, 1]} : vector<32x4xf32> to vector<32x1xf32>
    %21 = vector.extract_strided_slice %1 {offsets = [3, 0], sizes = [1, 256], strides = [1, 1]} : vector<4x256xf32> to vector<1x256xf32>
    %22 = vector.broadcast %20 : vector<32x1xf32> to vector<32x256xf32>
    %23 = vector.broadcast %21 : vector<1x256xf32> to vector<32x256xf32>
    %24 = arith.mulf %22, %23 : vector<32x256xf32>
    %25 = arith.addf %19, %24 : vector<32x256xf32>
    %c0_4 = arith.constant 0 : index
    %c0_5 = arith.constant 0 : index
    %26 = vector.load %arg4[%c0_4, %c0_5] : memref<32x1xf32, #tpu.memory_space<vmem>>, vector<32x1xf32>
    %27 = vector.broadcast %26 : vector<32x1xf32> to vector<32x256xf32>
    %28 = arith.addf %25, %27 : vector<32x256xf32>
    %c0_6 = arith.constant 0 : index
    %c0_7 = arith.constant 0 : index
    %c0_8 = arith.constant 0 : index
    %29 = vector.load %arg5[%c0_6, %c0_7, %c0_8] : memref<1x32x256xf32, #tpu.memory_space<vmem>>, vector<1x32x256xf32>
    %30 = vector.shape_cast %29 : vector<1x32x256xf32> to vector<32x256xf32>
    %31 = vector.shape_cast %28 : vector<32x256xf32> to vector<1x32x256xf32>
    tpu.vector_store %arg5[%c0_6, %c0_7, %c0_8], %31 {strides = array<i32>} : memref<1x32x256xf32, #tpu.memory_space<vmem>>, vector<1x32x256xf32>,
    return
  }
  func.func @transform_0(%arg0: i32, %arg1: i32) -> (i32, i32, i32) {
    %c0_i32 = arith.constant 0 : i32
    %c0_i32_0 = arith.constant 0 : i32
    return %arg0, %c0_i32, %arg1 : i32, i32, i32
  }
  func.func @transform_1(%arg0: i32, %arg1: i32) -> (i32, i32) {
    %c0_i32 = arith.constant 0 : i32
    %c0_i32_0 = arith.constant 0 : i32
    %c0_i32_1 = arith.constant 0 : i32
    return %c0_i32, %c0_i32_0 : i32, i32
  }
  func.func @transform_2(%arg0: i32, %arg1: i32) -> (i32, i32) {
    %c0_i32 = arith.constant 0 : i32
    %c0_i32_0 = arith.constant 0 : i32
    %c0_i32_1 = arith.constant 0 : i32
    return %c0_i32, %c0_i32_0 : i32, i32
  }
  func.func @transform_3(%arg0: i32, %arg1: i32) -> (i32, i32, i32) {
    %c0_i32 = arith.constant 0 : i32
    %c0_i32_0 = arith.constant 0 : i32
    return %arg0, %c0_i32, %arg1 : i32, i32, i32
  }
}

</mosaic_0001>

<bundles_post_ra>
// kernel: upsample_forward.1
= control target key start
LH: loop header
LB: loop body
LE: loop exit
PB: predicated region body
PF: predicated region fallthrough
CT: control target
= control target key end

     0   :  { %s638_s12 = smov 0   ;;  %s640_s13 = smov 0   ;;  %s725_s0 = inlined_call_operand.vmem [shape: f32[2,4,256], index: 0, kind: input, shape index: {}]   ;;  %s726_s1 = inlined_call_operand.vmem [shape: f32[32,4], index: 1, kind: input, shape index: {}]   ;;  %s727_s2 = inlined_call_operand.vmem [shape: f32[32,1], index: 2, kind: input, shape index: {}]   ;;  %s728_s3 = inlined_call_operand.vmem [shape: f32[2,32,256], index: 3, kind: output, shape index: {}]  }
   0x1   :  { %s642_s14 = smov 0  }
   0x2 LB: > { %s25_s15 = sadd.s32 1, %s608_s13  ;;  %p543_p0 = scmp.ge.s32.totalorder %s612_s14, 1  ;;  %s612_s14 = sphi %s642_s14, %s13_s14   ;;  %s608_s13 = sphi %s640_s13, %s730_s13   ;;  %s604_s12 = sphi %s638_s12, %s729_s12  }
   0x3   : > { %p27_p1 = scmp.ge.s32.totalorder %s25_s15, 2  ;;  %p158_p2 = scmp.lt.s32.totalorder %s612_s14, 3 }
   0x5   : > { %s732_s15 = smov (%p27_p1, %s25_s15), 0  ;;  %p159_p3 = pnand %p543_p0, %p158_p2 }
   0x6   : > { %p191_p4 = scmp.lt.s32.totalorder (!%p159_p3), %s604_s12, 1 }
   0x7   : > { %162 = sbr.rel (%p159_p3) target bundleno = 189 (0xbd), region = 32 }
   0xc   : > { %v213_v0 = vld [vmem:[%s726_s1 + $0x10] sm:$0xff]  ;;  %v211_v1 = vld [vmem:[%s726_s1] sm:$0xff]  ;;  %v614_v2 = vmov 0   ;;  %v214_v3 = vld [vmem:[%s726_s1 + $0x18] sm:$0xff]  ;;  %v615_v5 = vmov 1   ;;  %v616_v6 = vmov 2   ;;  %v236_v16 = vlaneseq }
   0xd   : > { %581 = vset.pattern.permute.xlu1 %v614_v2  ;;  %580 = vset.pattern.permute.xlu0 %v614_v2  ;;  %v212_v4 = vld [vmem:[%s726_s1 + $0x8] sm:$0xff]  ;;  %v617_v7 = vmov 3   ;;  %v412_v9 = vld [vmem:[%s727_s2] sm:$0xff]  ;;  %v414_v10 = vld [vmem:[%s727_s2 + $0x10] sm:$0xff]  ;;  %s734_s12 = smov (!%p191_p4, %s604_s12), 1 }
   0xe   : > { %227 = vperm.xlu1 %581, %v213_v0   ;;  %217 = vperm.xlu0 %580, %v211_v1   ;;  %v413_v8 = vld [vmem:[%s727_s2 + $0x8] sm:$0xff]  ;;  %v415_v11 = vld [vmem:[%s727_s2 + $0x18] sm:$0xff]  ;;  %s550_s5 = sshll.u32 %s734_s12, 3  ;;  %v237_v19 = vshrl.u32 %v236_v16, 7  ;;  %s551_s9 = sshll.u32 %s734_s12, 6 }
   0xf   : > { %s198_s8 = scalar_lea.vmem %s725_s0, %s550_s5  ;;  %s704_s12 = scalar_lea.vmem %s728_s3, %s551_s9 }
  0x10   : > { %v280_v22 = vsub.s32 1, %v237_v19  ;;  %v284_v23 = vsub.s32 5, %v237_v19  ;;  %v238_v24 = vsub.s32 0, %v237_v19  ;;  %v242_v25 = vsub.s32 4, %v237_v19  ;;  %v210_v28 = vld [vmem:[%s198_s8] sm:$0xff] }
  0x11   : > { %v330_v26 = vsub.s32 2, %v237_v19  ;;  %v334_v27 = vsub.s32 6, %v237_v19  ;;  %v380_v37 = vsub.s32 3, %v237_v19  ;;  %v384_v38 = vsub.s32 7, %v237_v19 }
  0x12   : > { %232 = vperm.xlu1 %581, %v214_v3   ;;  %222 = vperm.xlu0 %580, %v212_v4   ;;  %v281_v29 = vrot.slane %v210_v28, %v280_v22  ;;  %v285_v30 = vrot.slane %v210_v28, %v284_v23  ;;  %v239_v33 = vrot.slane %v210_v28, %v238_v24 }
  0x13   : > { %v243_v34 = vrot.slane %v210_v28, %v242_v25  ;;  %v331_v35 = vrot.slane %v210_v28, %v330_v26  ;;  %v335_v36 = vrot.slane %v210_v28, %v334_v27  ;;  %v381_v47 = vrot.slane %v210_v28, %v380_v37 }
  0x14   : > { %v291_v39 = vrot.slane %v281_v29, %v280_v22  ;;  %v295_v40 = vrot.slane %v285_v30, %v280_v22  ;;  %v249_v43 = vrot.slane %v239_v33, %v238_v24  ;;  %v385_v48 = vrot.slane %v210_v28, %v384_v38 }
  0x15   : > { %v253_v44 = vrot.slane %v243_v34, %v238_v24  ;;  %v341_v45 = vrot.slane %v331_v35, %v330_v26  ;;  %v345_v46 = vrot.slane %v335_v36, %v330_v26  ;;  %v391_v63 = vrot.slane %v381_v47, %v380_v37 }
  0x16   : > { %583 = vset.pattern.permute.xlu1 %v615_v5  ;;  %582 = vset.pattern.permute.xlu0 %v615_v5 }
  0x17   : > { %267 = vperm.xlu1 %583, %v212_v4   ;;  %263 = vperm.xlu0 %582, %v211_v1  }
  0x1b   : > { %271 = vperm.xlu1 %583, %v213_v0   ;;  %275 = vperm.xlu0 %582, %v214_v3  }
  0x1f   : > { %584 = vset.pattern.permute.xlu1 %v616_v6  ;;  %585 = vset.pattern.permute.xlu0 %v616_v6 }
  0x20   : > { %313 = vperm.xlu1 %584, %v211_v1   ;;  %317 = vperm.xlu0 %585, %v212_v4  }
  0x24   : > { %321 = vperm.xlu1 %584, %v213_v0   ;;  %586 = vset.pattern.permute.xlu0 %v617_v7 }
  0x25   : > { %363 = vperm.xlu0 %586, %v211_v1  }
  0x28   : > { %325 = vperm.xlu1 %584, %v214_v3  }
  0x29   : > { %375 = vperm.xlu0 %586, %v214_v3  }
  0x2c   : > { %587 = vset.pattern.permute.xlu1 %v617_v7 }
  0x2d   : > { %367 = vperm.xlu1 %587, %v212_v4   ;;  %589 = vset.pattern.permute.xlu0 %v614_v2 }
  0x2e   : > { %423 = vperm.xlu0 %589, %v413_v8  }
  0x31   : > { %371 = vperm.xlu1 %587, %v213_v0   ;;  %v395_v0 = vrot.slane %v385_v48, %v380_v37 }
  0x35   : > { %588 = vset.pattern.permute.xlu1 %v614_v2 }
  0x36   : > { %418 = vperm.xlu1 %588, %v412_v9  }
  0x3a   : > { %428 = vperm.xlu1 %588, %v414_v10  }
  0x3e   : > { %433 = vperm.xlu1 %588, %v415_v11  }
  0x89   : > { %v682_v12 = vpop.permute.xlu1 %227  ;;  %v218_v13 = vpop.permute.xlu0 %217 }
  0x8a   : > { %v254_v54 = vmul.f32 %v249_v43, %v218_v13  ;;  %v255_v55 = vmul.f32 %v253_v44, %v218_v13  ;;  %v258_v19 = vmul.f32 %v249_v43, %v682_v12  ;;  %v259_v22 = vmul.f32 %v253_v44, %v682_v12 }
  0x8d   : > { %v685_v14 = vpop.permute.xlu1 %232  ;;  %v223_v15 = vpop.permute.xlu0 %222 }
  0x8e   : > { %v256_v49 = vmul.f32 %v249_v43, %v223_v15  ;;  %v257_v50 = vmul.f32 %v253_v44, %v223_v15  ;;  %v260_v29 = vmul.f32 %v249_v43, %v685_v14  ;;  %v261_v12 = vmul.f32 %v253_v44, %v685_v14 }
  0x92   : > { %v268_v17 = vpop.permute.xlu1 %267  ;;  %v264_v18 = vpop.permute.xlu0 %263 }
  0x93   : > { %v298_v51 = vmul.f32 %v291_v39, %v268_v17  ;;  %v299_v52 = vmul.f32 %v295_v40, %v268_v17  ;;  %v296_v56 = vmul.f32 %v291_v39, %v264_v18  ;;  %v297_v57 = vmul.f32 %v295_v40, %v264_v18 }
  0x95   : > { %v306_v61 = vadd.f32 %v298_v51, %v256_v49  ;;  %v307_v62 = vadd.f32 %v299_v52, %v257_v50  ;;  %v304_v1 = vadd.f32 %v296_v56, %v254_v54  ;;  %v305_v2 = vadd.f32 %v297_v57, %v255_v55 }
  0x96   : > { %v272_v20 = vpop.permute.xlu1 %271  ;;  %v691_v21 = vpop.permute.xlu0 %275 }
  0x97   : > { %v300_v10 = vmul.f32 %v291_v39, %v272_v20  ;;  %v301_v11 = vmul.f32 %v295_v40, %v272_v20  ;;  %v302_v23 = vmul.f32 %v291_v39, %v691_v21  ;;  %v303_v24 = vmul.f32 %v295_v40, %v691_v21 }
  0x99   : > { %v309_v21 = vadd.f32 %v301_v11, %v259_v22  ;;  %v310_v39 = vadd.f32 %v302_v23, %v260_v29  ;;  %v311_v40 = vadd.f32 %v303_v24, %v261_v12 }
  0x9b   : > { %v314_v31 = vpop.permute.xlu1 %313  ;;  %v318_v32 = vpop.permute.xlu0 %317 }
  0x9c   : > { %v348_v58 = vmul.f32 %v341_v45, %v318_v32  ;;  %v349_v59 = vmul.f32 %v345_v46, %v318_v32  ;;  %v346_v3 = vmul.f32 %v341_v45, %v314_v31  ;;  %v347_v4 = vmul.f32 %v345_v46, %v314_v31 }
  0x9d   : > { %v308_v32 = vadd.f32 %v300_v10, %v258_v19 }
  0x9e   : > { %v356_v6 = vadd.f32 %v348_v58, %v306_v61  ;;  %v357_v7 = vadd.f32 %v349_v59, %v307_v62  ;;  %v354_v20 = vadd.f32 %v346_v3, %v304_v1  ;;  %v355_v26 = vadd.f32 %v347_v4, %v305_v2 }
  0x9f   : > { %v322_v41 = vpop.permute.xlu1 %321 }
  0xa0   : > { %v364_v42 = vpop.permute.xlu0 %363  ;;  %v350_v30 = vmul.f32 %v341_v45, %v322_v41  ;;  %v351_v31 = vmul.f32 %v345_v46, %v322_v41 }
  0xa1   : > { %v396_v15 = vmul.f32 %v391_v63, %v364_v42  ;;  %v397_v16 = vmul.f32 %v395_v0, %v364_v42 }
  0xa2   : > { %v358_v43 = vadd.f32 %v350_v30, %v308_v32  ;;  %v359_v14 = vadd.f32 %v351_v31, %v309_v21 }
  0xa3   : > { %v326_v53 = vpop.permute.xlu1 %325  ;;  %v404_v33 = vadd.f32 %v396_v15, %v354_v20  ;;  %v405_v34 = vadd.f32 %v397_v16, %v355_v26 }
  0xa4   : > { %v376_v60 = vpop.permute.xlu0 %375  ;;  %v352_v35 = vmul.f32 %v341_v45, %v326_v53  ;;  %v353_v36 = vmul.f32 %v345_v46, %v326_v53 }
  0xa5   : > { %v402_v47 = vmul.f32 %v391_v63, %v376_v60  ;;  %v403_v48 = vmul.f32 %v395_v0, %v376_v60 }
  0xa6   : > { %v360_v49 = vadd.f32 %v352_v35, %v310_v39  ;;  %v361_v50 = vadd.f32 %v353_v36, %v311_v40 }
  0xa8   : > { %v368_v5 = vpop.permute.xlu1 %367  ;;  %v410_v54 = vadd.f32 %v402_v47, %v360_v49  ;;  %v411_v55 = vadd.f32 %v403_v48, %v361_v50 }
  0xa9   : > { %v398_v8 = vmul.f32 %v391_v63, %v368_v5  ;;  %v399_v9 = vmul.f32 %v395_v0, %v368_v5  ;;  %v424_v13 = vpop.permute.xlu0 %423 }
  0xab   : > { %v406_v17 = vadd.f32 %v398_v8, %v356_v6  ;;  %v407_v18 = vadd.f32 %v399_v9, %v357_v7 }
  0xac   : > { %v372_v25 = vpop.permute.xlu1 %371 }
  0xad   : > { %v438_v27 = vadd.f32 %v424_v13, %v406_v17  ;;  %v439_v28 = vadd.f32 %v424_v13, %v407_v18  ;;  %v400_v37 = vmul.f32 %v391_v63, %v372_v25  ;;  %v401_v38 = vmul.f32 %v395_v0, %v372_v25 }
  0xaf   : > { %446 = vst [vmem:[%s704_s12 + $0x10] sm:$0xff] %v438_v27  ;;  %447 = vst [vmem:[%s704_s12 + $0x18] sm:$0xff] %v439_v28  ;;  %v408_v45 = vadd.f32 %v400_v37, %v358_v43  ;;  %v409_v46 = vadd.f32 %v401_v38, %v359_v14 }
  0xb1   : > { %v419_v42 = vpop.permute.xlu1 %418 }
  0xb2   : > { %v436_v41 = vadd.f32 %v419_v42, %v404_v33  ;;  %v437_v44 = vadd.f32 %v419_v42, %v405_v34 }
  0xb4   : > { %444 = vst [vmem:[%s704_s12] sm:$0xff] %v436_v41  ;;  %445 = vst [vmem:[%s704_s12 + $0x8] sm:$0xff] %v437_v44 }
  0xb5   : > { %v429_v51 = vpop.permute.xlu1 %428 }
  0xb6   : > { %v440_v52 = vadd.f32 %v429_v51, %v408_v45  ;;  %v441_v53 = vadd.f32 %v429_v51, %v409_v46 }
  0xb8   : > { %448 = vst [vmem:[%s704_s12 + $0x20] sm:$0xff] %v440_v52  ;;  %449 = vst [vmem:[%s704_s12 + $0x28] sm:$0xff] %v441_v53 }
  0xb9   : > { %v434_v56 = vpop.permute.xlu1 %433 }
  0xba   : > { %v442_v57 = vadd.f32 %v434_v56, %v410_v54  ;;  %v443_v58 = vadd.f32 %v434_v56, %v411_v55 }
  0xbc   : > { %450 = vst [vmem:[%s704_s12 + $0x30] sm:$0xff] %v442_v57  ;;  %451 = vst [vmem:[%s704_s12 + $0x38] sm:$0xff] %v443_v58 }
  0xbd PF: > { %s13_s14 = sadd.s32 1, %s612_s14   ;;  %s729_s12 = smov %s608_s13 }
  0xbe   : > { %p10_p5 = scmp.ge.s32.totalorder %s13_s14, 4   ;;  %s730_s13 = smov %s732_s15 }
  0xc0   :  { %12 = sbr.rel (!%p10_p5) target bundleno = 2 (0x2), region = 62 }

</bundles_post_ra>
